<compile_context>
chip_gen: v6e
topology: v6e:2x2x1
jax: 0.10.0
libtpu: 0.0.40
codegen_flags: <defaults>
</compile_context>

<pallas_src>
import functools

import jax
import jax.numpy as jnp
import numpy as np
from jax.experimental import pallas as pl
from jax.experimental.pallas import tpu as pltpu


def gated_conv_kernel(p_ref, w1_ref, b1_ref,
                      w2ev_ref, w2nv_ref, w2eg_ref, w2ng_ref,
                      bv_ref, bg_ref, o_ref):
    # p_ref   : (9*C_in, M)   im2col patches, M = N*H*W (lane-dense)
    # w1_ref  : (C_hid, 9*C_in)   3x3 conv weights, tap-major columns
    # b1_ref  : (C_hid, 1)
    # w2ev/w2nv/w2eg/w2ng : (C_in, C_hid)  1x1 conv weight quarters
    #     (e = multiplies elu(h), n = multiplies elu(-h); v = val rows, g = gate rows)
    # bv/bg   : (C_in, 1)
    # o_ref   : (C_in, M)
    C_in = o_ref.shape[0]

    p = p_ref[...]                                              # (9*C_in, M)

    # ---- 3x3 conv (padding=1): single im2col matmul ----
    h = jnp.dot(w1_ref[...], p,
                preferred_element_type=jnp.float32) + b1_ref[...]   # (C_hid, M)

    # ---- ConcatELU with a single exp ----
    e_m1 = jnp.exp(-jnp.abs(h)) - 1.0
    pos = h > 0
    eh = jnp.where(pos, h, e_m1)        # elu(h)
    enh = jnp.where(pos, e_m1, -h)      # elu(-h)

    # ---- 1x1 conv, pre-split weights (no concat, no output slicing) ----
    val = (jnp.dot(w2ev_ref[...], eh, preferred_element_type=jnp.float32)
           + jnp.dot(w2nv_ref[...], enh, preferred_element_type=jnp.float32)
           + bv_ref[...])                                        # (C_in, M)
    gate = (jnp.dot(w2eg_ref[...], eh, preferred_element_type=jnp.float32)
            + jnp.dot(w2ng_ref[...], enh, preferred_element_type=jnp.float32)
            + bg_ref[...])                                       # (C_in, M)

    # ---- gate + residual (residual = centre tap of the im2col patches) ----
    x = p[4 * C_in:5 * C_in, :]                                  # (C_in, M)
    o_ref[...] = x + val * jax.nn.sigmoid(gate)


@jax.jit
def gated_conv(x_nchw, w1, b1, w2, b2):
    """x_nchw: (N, C_in, H, W) f32; torch-style weights:
       w1: (C_hid, C_in, 3, 3), b1: (C_hid,), w2: (2*C_in, 2*C_hid, 1, 1), b2: (2*C_in,)"""
    N, C_in, H, W = x_nchw.shape
    C_hid = w1.shape[0]
    M = N * H * W

    x = x_nchw.astype(jnp.float32)

    # ---- wrapper-side im2col: (9*C_in, N*H*W), tap-major rows ----
    xpad = jnp.pad(x, ((0, 0), (0, 0), (1, 1), (1, 1)))          # (N, C_in, H+2, W+2)
    taps = [xpad[:, :, dy:dy + H, dx:dx + W]                      # (N, C_in, H, W)
            for dy in range(3) for dx in range(3)]
    patches = jnp.stack(taps, axis=0)                             # (9, N, C_in, H, W)
    patches_t = jnp.transpose(patches, (0, 2, 1, 3, 4)).reshape(9 * C_in, M)

    # ---- weight repacking ----
    # w1[o, c, dy, dx] -> w1t[o, (dy*3+dx)*C_in + c]
    w1t = jnp.transpose(w1, (0, 2, 3, 1)).reshape(C_hid, 9 * C_in).astype(jnp.float32)
    b1t = b1.reshape(C_hid, 1).astype(jnp.float32)

    w2_2d = w2.reshape(2 * C_in, 2 * C_hid).astype(jnp.float32)   # out_ch x in_ch
    w2_ev = w2_2d[:C_in, :C_hid]      # elu(h)  -> val
    w2_nv = w2_2d[:C_in, C_hid:]      # elu(-h) -> val
    w2_eg = w2_2d[C_in:, :C_hid]      # elu(h)  -> gate
    w2_ng = w2_2d[C_in:, C_hid:]      # elu(-h) -> gate
    bv = b2[:C_in].reshape(C_in, 1).astype(jnp.float32)
    bg = b2[C_in:].reshape(C_in, 1).astype(jnp.float32)

    vmem = pl.BlockSpec(memory_space=pltpu.MemorySpace.VMEM)
    out_t = pl.pallas_call(
        gated_conv_kernel,
        out_shape=jax.ShapeDtypeStruct((C_in, M), jnp.float32),
        in_specs=[vmem] * 9,
        out_specs=vmem,
    )(patches_t, w1t, b1t, w2_ev, w2_nv, w2_eg, w2_ng, bv, bg)

    # (C_in, N*H*W) -> (N, C_in, H, W)
    return jnp.transpose(out_t.reshape(C_in, N, H, W), (1, 0, 2, 3))


def gated_conv_reference(x_nchw, w1, b1, w2, b2):
    """Pure-JAX reference using lax conv (matches the PyTorch module)."""
    N, C_in, H, W = x_nchw.shape
    x = jnp.transpose(x_nchw, (0, 2, 3, 1)).astype(jnp.float32)
    w1_hwio = jnp.transpose(w1, (2, 3, 1, 0))
    h = jax.lax.conv_general_dilated(
        x, w1_hwio, (1, 1), "SAME",
        dimension_numbers=("NHWC", "HWIO", "NHWC")) + b1
    a = jnp.concatenate([jax.nn.elu(h), jax.nn.elu(-h)], axis=-1)
    w2_hwio = jnp.transpose(w2, (2, 3, 1, 0))
    o = jax.lax.conv_general_dilated(
        a, w2_hwio, (1, 1), "SAME",
        dimension_numbers=("NHWC", "HWIO", "NHWC")) + b2
    val, gate = o[..., :C_in], o[..., C_in:]
    out = x + val * jax.nn.sigmoid(gate)
    return jnp.transpose(out, (0, 3, 1, 2))


if __name__ == "__main__":
    # Small shapes consistent with the module: batch=2, c_in=4, c_hidden=8, 16x16 spatial.
    N, C_in, C_hid, H, W = 2, 4, 8, 16, 16

    key = jax.random.PRNGKey(0)
    kx, kw1, kb1, kw2, kb2 = jax.random.split(key, 5)

    x = jax.random.normal(kx, (N, C_in, H, W), jnp.float32)
    w1 = 0.1 * jax.random.normal(kw1, (C_hid, C_in, 3, 3), jnp.float32)
    b1 = 0.1 * jax.random.normal(kb1, (C_hid,), jnp.float32)
    w2 = 0.1 * jax.random.normal(kw2, (2 * C_in, 2 * C_hid, 1, 1), jnp.float32)
    b2 = 0.1 * jax.random.normal(kb2, (2 * C_in,), jnp.float32)

    y = gated_conv(x, w1, b1, w2, b2)
    y = jax.block_until_ready(y)

    y_ref = jax.block_until_ready(gated_conv_reference(x, w1, b1, w2, b2))
    np.testing.assert_allclose(np.asarray(y), np.asarray(y_ref), atol=2e-5, rtol=2e-5)

    print("KERNEL_OK")
</pallas_src>

<mosaic_0001>
module attributes {stable_mosaic.version = 11 : i64} {
  func.func @gated_conv_kernel(%arg0: memref<36x512xf32, #tpu.memory_space<vmem>>, %arg1: memref<8x36xf32, #tpu.memory_space<vmem>>, %arg2: memref<8x1xf32, #tpu.memory_space<vmem>>, %arg3: memref<4x8xf32, #tpu.memory_space<vmem>>, %arg4: memref<4x8xf32, #tpu.memory_space<vmem>>, %arg5: memref<4x8xf32, #tpu.memory_space<vmem>>, %arg6: memref<4x8xf32, #tpu.memory_space<vmem>>, %arg7: memref<4x1xf32, #tpu.memory_space<vmem>>, %arg8: memref<4x1xf32, #tpu.memory_space<vmem>>, %arg9: memref<4x512xf32, #tpu.memory_space<vmem>>) attributes {dimension_semantics = [], scalar_prefetch = 0 : i64, scratch_operands = 0 : i64, tpu.core_type = #tpu.core_type<tc>} {
    %c0 = arith.constant 0 : index
    %c0_0 = arith.constant 0 : index
    %0 = vector.load %arg0[%c0, %c0_0] : memref<36x512xf32, #tpu.memory_space<vmem>>, vector<36x512xf32>
    %c0_1 = arith.constant 0 : index
    %c0_2 = arith.constant 0 : index
    %1 = vector.load %arg1[%c0_1, %c0_2] : memref<8x36xf32, #tpu.memory_space<vmem>>, vector<8x36xf32>
    %cst = arith.constant dense<0.000000e+00> : vector<8x512xf32>
    %2 = tpu.matmul %1, %0, %cst {dimension_numbers = #tpu.dot_dimension_numbers<[1], [0], [0], [1], [0, 0, 1, 1], [], []>} : vector<8x36xf32>, vector<36x512xf32>, vector<8x512xf32> -> vector<8x512xf32>
    %c0_3 = arith.constant 0 : index
    %c0_4 = arith.constant 0 : index
    %3 = vector.load %arg2[%c0_3, %c0_4] : memref<8x1xf32, #tpu.memory_space<vmem>>, vector<8x1xf32>
    %4 = vector.broadcast %3 : vector<8x1xf32> to vector<8x512xf32>
    %5 = arith.addf %2, %4 : vector<8x512xf32>
    %6 = math.absf %5 : vector<8x512xf32>
    %cst_5 = arith.constant 0.000000e+00 : f32
    %7 = vector.broadcast %cst_5 : f32 to vector<8x512xf32>
    %8 = arith.subf %7, %6 : vector<8x512xf32>
    %9 = math.exp %8 : vector<8x512xf32>
    %cst_6 = arith.constant 1.000000e+00 : f32
    %10 = vector.broadcast %cst_6 : f32 to vector<8x512xf32>
    %11 = arith.subf %9, %10 : vector<8x512xf32>
    %cst_7 = arith.constant 0.000000e+00 : f32
    %12 = vector.broadcast %cst_7 : f32 to vector<8x512xf32>
    %13 = arith.cmpf ogt, %5, %12 : vector<8x512xf32>
    %14 = arith.select %13, %5, %11 : vector<8x512xi1>, vector<8x512xf32>
    %cst_8 = arith.constant 0.000000e+00 : f32
    %15 = vector.broadcast %cst_8 : f32 to vector<8x512xf32>
    %16 = arith.subf %15, %5 : vector<8x512xf32>
    %17 = arith.select %13, %11, %16 : vector<8x512xi1>, vector<8x512xf32>
    %c0_9 = arith.constant 0 : index
    %c0_10 = arith.constant 0 : index
    %18 = vector.load %arg3[%c0_9, %c0_10] : memref<4x8xf32, #tpu.memory_space<vmem>>, vector<4x8xf32>
    %cst_11 = arith.constant dense<0.000000e+00> : vector<4x512xf32>
    %19 = tpu.matmul %18, %14, %cst_11 {dimension_numbers = #tpu.dot_dimension_numbers<[1], [0], [0], [1], [0, 0, 1, 1], [], []>} : vector<4x8xf32>, vector<8x512xf32>, vector<4x512xf32> -> vector<4x512xf32>
    %c0_12 = arith.constant 0 : index
    %c0_13 = arith.constant 0 : index
    %20 = vector.load %arg4[%c0_12, %c0_13] : memref<4x8xf32, #tpu.memory_space<vmem>>, vector<4x8xf32>
    %cst_14 = arith.constant dense<0.000000e+00> : vector<4x512xf32>
    %21 = tpu.matmul %20, %17, %cst_14 {dimension_numbers = #tpu.dot_dimension_numbers<[1], [0], [0], [1], [0, 0, 1, 1], [], []>} : vector<4x8xf32>, vector<8x512xf32>, vector<4x512xf32> -> vector<4x512xf32>
    %22 = arith.addf %19, %21 : vector<4x512xf32>
    %c0_15 = arith.constant 0 : index
    %c0_16 = arith.constant 0 : index
    %23 = vector.load %arg7[%c0_15, %c0_16] : memref<4x1xf32, #tpu.memory_space<vmem>>, vector<4x1xf32>
    %24 = vector.broadcast %23 : vector<4x1xf32> to vector<4x512xf32>
    %25 = arith.addf %22, %24 : vector<4x512xf32>
    %c0_17 = arith.constant 0 : index
    %c0_18 = arith.constant 0 : index
    %26 = vector.load %arg5[%c0_17, %c0_18] : memref<4x8xf32, #tpu.memory_space<vmem>>, vector<4x8xf32>
    %cst_19 = arith.constant dense<0.000000e+00> : vector<4x512xf32>
    %27 = tpu.matmul %26, %14, %cst_19 {dimension_numbers = #tpu.dot_dimension_numbers<[1], [0], [0], [1], [0, 0, 1, 1], [], []>} : vector<4x8xf32>, vector<8x512xf32>, vector<4x512xf32> -> vector<4x512xf32>
    %c0_20 = arith.constant 0 : index
    %c0_21 = arith.constant 0 : index
    %28 = vector.load %arg6[%c0_20, %c0_21] : memref<4x8xf32, #tpu.memory_space<vmem>>, vector<4x8xf32>
    %cst_22 = arith.constant dense<0.000000e+00> : vector<4x512xf32>
    %29 = tpu.matmul %28, %17, %cst_22 {dimension_numbers = #tpu.dot_dimension_numbers<[1], [0], [0], [1], [0, 0, 1, 1], [], []>} : vector<4x8xf32>, vector<8x512xf32>, vector<4x512xf32> -> vector<4x512xf32>
    %30 = arith.addf %27, %29 : vector<4x512xf32>
    %c0_23 = arith.constant 0 : index
    %c0_24 = arith.constant 0 : index
    %31 = vector.load %arg8[%c0_23, %c0_24] : memref<4x1xf32, #tpu.memory_space<vmem>>, vector<4x1xf32>
    %32 = vector.broadcast %31 : vector<4x1xf32> to vector<4x512xf32>
    %33 = arith.addf %30, %32 : vector<4x512xf32>
    %34 = vector.extract_strided_slice %0 {offsets = [16, 0], sizes = [4, 512], strides = [1, 1]} : vector<36x512xf32> to vector<4x512xf32>
    %35 = arith.negf %33 : vector<4x512xf32>
    %36 = math.exp %35 : vector<4x512xf32>
    %cst_25 = arith.constant 1.000000e+00 : f32
    %37 = vector.broadcast %cst_25 : f32 to vector<4x512xf32>
    %38 = arith.addf %37, %36 : vector<4x512xf32>
    %39 = arith.divf %37, %38 : vector<4x512xf32>
    %40 = arith.mulf %25, %39 : vector<4x512xf32>
    %41 = arith.addf %34, %40 : vector<4x512xf32>
    %c0_26 = arith.constant 0 : index
    %c0_27 = arith.constant 0 : index
    %42 = vector.load %arg9[%c0_26, %c0_27] : memref<4x512xf32, #tpu.memory_space<vmem>>, vector<4x512xf32>
    tpu.vector_store %arg9[%c0_26, %c0_27], %41 {strides = array<i32>} : memref<4x512xf32, #tpu.memory_space<vmem>>, vector<4x512xf32>,
    return
  }
}

</mosaic_0001>

<bundles_post_ra>
// kernel: gated_conv.1
= control target key start
LH: loop header
LB: loop body
LE: loop exit
PB: predicated region body
PF: predicated region fallthrough
CT: control target
= control target key end

     0   :  { %vm63_vm0 = vcmask 1043456   ;;  %v955_v3 = vmov 0.0   ;;  %vm59_vm1 = vcmask 293888   ;;  %v956_v23 = vmov 0   ;;  %s1137_s0 = inlined_call_operand.vmem [shape: f32[36,512], index: 0, kind: input, shape index: {}]   ;;  %s1138_s1 = inlined_call_operand.vmem [shape: f32[8,36], index: 1, kind: input, shape index: {}]   ;;  %s1139_s2 = inlined_call_operand.vmem [shape: f32[8,1], index: 2, kind: input, shape index: {}]   ;;  %s1140_s8 = inlined_call_operand.vmem [shape: f32[4,1], index: 8, kind: input, shape index: {}]   ;;  %s1141_s7 = inlined_call_operand.vmem [shape: f32[4,1], index: 7, kind: input, shape index: {}]   ;;  %s1142_s4 = inlined_call_operand.vmem [shape: f32[4,8], index: 4, kind: input, shape index: {}]   ;;  %s1143_s3 = inlined_call_operand.vmem [shape: f32[4,8], index: 3, kind: input, shape index: {}]   ;;  %s1144_s6 = inlined_call_operand.vmem [shape: f32[4,8], index: 6, kind: input, shape index: {}]   ;;  %s1145_s5 = inlined_call_operand.vmem [shape: f32[4,8], index: 5, kind: input, shape index: {}]   ;;  %s1146_s9 = inlined_call_operand.vmem [shape: f32[4,512], index: 9, kind: output, shape index: {}]  }
   0x1   :  { %v49_v0 = vld [vmem:[%s1137_s0 + $0x88] sm:$0xf]  ;;  %v51_v1 = vld [vmem:[%s1137_s0 + $0x98] sm:$0xf]  ;;  %v48_v2 = vld [vmem:[%s1137_s0 + $0x80] sm:$0xf]  ;;  %140 = vmatprep.mubr.f32.mxu0 %v955_v3  ;;  %211 = vmatprep.mubr.f32.mxu1 %v955_v3 }
   0x2   :  { %905 = vmatprep.subr.msk.mxu0 %vm63_vm0, %v49_v0  ;;  %908 = vmatprep.subr.msk.mxu1 %vm63_vm0, %v51_v1  ;;  %v50_v4 = vld [vmem:[%s1137_s0 + $0x90] sm:$0xf]  ;;  %v45_v5 = vld [vmem:[%s1137_s0 + $0x68] sm:$0xff]  ;;  %v47_v6 = vld [vmem:[%s1137_s0 + $0x78] sm:$0xff]  ;;  %vm256_vm2 = vcmask 64512  }
   0x3   :  { %906 = vmatpush1.msk.msra.mxu0 %vm63_vm0, %v48_v2  ;;  %909 = vmatpush1.msk.msra.mxu1 %vm63_vm0, %v50_v4  ;;  %v44_v7 = vld [vmem:[%s1137_s0 + $0x60] sm:$0xff]  ;;  %v46_v8 = vld [vmem:[%s1137_s0 + $0x70] sm:$0xff]  ;;  %v1036_v9 = vld [vmem:[%s1137_s0 + $0x48] sm:$0xff] }
   0x4   :  { %100 = vmatprep.subr.mxu0 %v45_v5  ;;  %171 = vmatprep.subr.mxu1 %v47_v6  ;;  %v1041_v10 = vld [vmem:[%s1137_s0 + $0x58] sm:$0xff]  ;;  %v1046_v11 = vld [vmem:[%s1137_s0 + $0x40] sm:$0xff]  ;;  %v1051_v12 = vld [vmem:[%s1137_s0 + $0x50] sm:$0xff] }
   0x5   :  { %101 = vmatpush1.msra.mxu0 %v44_v7  ;;  %172 = vmatpush1.msra.mxu1 %v46_v8  ;;  %v37_v13 = vld [vmem:[%s1137_s0 + $0x28] sm:$0xff]  ;;  %v39_v14 = vld [vmem:[%s1137_s0 + $0x38] sm:$0xff]  ;;  %v36_v15 = vld [vmem:[%s1137_s0 + $0x20] sm:$0xff] }
   0x6   :  { %102 = vmatprep.subr.mxu0 %v1036_v9  ;;  %173 = vmatprep.subr.mxu1 %v1041_v10  ;;  %v38_v16 = vld [vmem:[%s1137_s0 + $0x30] sm:$0xff]  ;;  %v33_v17 = vld [vmem:[%s1137_s0 + $0x8] sm:$0xff]  ;;  %v35_v18 = vld [vmem:[%s1137_s0 + $0x18] sm:$0xff] }
   0x7   :  { %103 = vmatpush1.msra.mxu0 %v1046_v11  ;;  %174 = vmatpush1.msra.mxu1 %v1051_v12  ;;  %v32_v19 = vld [vmem:[%s1137_s0] sm:$0xff]  ;;  %v34_v20 = vld [vmem:[%s1137_s0 + $0x10] sm:$0xff] }
   0x8   :  { %104 = vmatprep.subr.mxu0 %v37_v13  ;;  %175 = vmatprep.subr.mxu1 %v39_v14  ;;  %v52_v21 = vld [vmem:[%s1138_s1] sm:$0xff] }
   0x9   :  { %105 = vmatpush1.msra.mxu0 %v36_v15  ;;  %176 = vmatpush1.msra.mxu1 %v38_v16  ;;  %v53_v22 = vld [vmem:[%s1139_s2] sm:$0xff] }
   0xa   :  { %106 = vmatprep.subr.mxu0 %v33_v17  ;;  %177 = vmatprep.subr.mxu1 %v35_v18  ;;  %v849_v24 = vld [vmem:[%s1140_s8] sm:$0xf] }
   0xb   :  { %107 = vmatpush1.msra.mxu0 %v32_v19  ;;  %178 = vmatpush1.msra.mxu1 %v34_v20  ;;  %v547_v25 = vld [vmem:[%s1141_s7] sm:$0xf] }
   0xc   :  { %907 = vmatmul.mubr.msk.f32.vlgmr.msra.gmra.mxu0 %vm59_vm1, %v52_v21  ;;  %910 = vmatmul.mubr.msk.f32.vlgmr.msra.gmra.mxu1 %vm59_vm1, %v52_v21  ;;  %v255_v60 = vld [vmem:[%s1142_s4] sm:$0xf] }
   0xd   :  { %929 = vset.pattern.permute.xlu0 %v956_v23  ;;  %324 = vmatprep.mubr.f32.mxu0 %v955_v3  ;;  %v254_v5 = vld [vmem:[%s1143_s3] sm:$0xf] }
   0xe   :  { %56 = vperm.xlu0 %929, %v53_v22   ;;  %395 = vmatprep.mubr.f32.mxu1 %v955_v3  ;;  %v558_v6 = vld [vmem:[%s1144_s6] sm:$0xf] }
   0xf   :  { %930 = vset.pattern.permute.xlu1 %v956_v23  ;;  %v557_v7 = vld [vmem:[%s1145_s5] sm:$0xf] }
  0x10   :  { %550 = vperm.xlu1 %930, %v547_v25  }
  0x12   :  { %852 = vperm.xlu0 %929, %v849_v24  }
  0x89   :  { %v57_v26 = vpop.permute.xlu0 %56 }
  0xcc   :  { %v142_v27 = vpop.f32.mrf.mxu0  ;;  %v213_v28 = vpop.f32.mrf.mxu1 }
  0xcd   :  { %v143_v29 = vadd.f32 %v142_v27, %v57_v26  ;;  %v214_v30 = vadd.f32 %v213_v28, %v57_v26 }
  0xce   :  { %v144_v31 = vpop.f32.mrf.mxu0  ;;  %v215_v32 = vpop.f32.mrf.mxu1 }
  0xcf   :  { %v218_v33 = vand.u32 2147483647, %v143_v29  ;;  %v220_v34 = vand.u32 2147483647, %v214_v30  ;;  %v145_v35 = vadd.f32 %v144_v31, %v57_v26  ;;  %v216_v36 = vadd.f32 %v215_v32, %v57_v26 }
  0xd0   :  { %v246_v57 = vsub.f32 0.0, %v143_v29  ;;  %vm238_vm5 = vcmp.gt.f32.partialorder %v143_v29, 0.0  ;;  %v248_v59 = vsub.f32 0.0, %v214_v30  ;;  %vm240_vm6 = vcmp.gt.f32.partialorder %v214_v30, 0.0 }
  0xd1   :  { %v222_v37 = vsub.f32 0.0, %v218_v33  ;;  %v224_v38 = vsub.f32 0.0, %v220_v34  ;;  %v219_v39 = vand.u32 2147483647, %v145_v35  ;;  %v221_v40 = vand.u32 2147483647, %v216_v36 }
  0xd2   :  { %v247_v53 = vsub.f32 0.0, %v145_v35  ;;  %vm239_vm3 = vcmp.gt.f32.partialorder %v145_v35, 0.0  ;;  %v249_v56 = vsub.f32 0.0, %v216_v36  ;;  %vm241_vm4 = vcmp.gt.f32.partialorder %v216_v36, 0.0 }
  0xd3   :  { %v226_v41 = vmul.f32 1.442695, %v222_v37  ;;  %v230_v42 = vmul.f32 1.442695, %v224_v38  ;;  %v223_v43 = vsub.f32 0.0, %v219_v39  ;;  %v225_v44 = vsub.f32 0.0, %v221_v40 }
  0xd5   :  { %931 = vpow2.f32 %v226_v41  ;;  %v228_v45 = vmul.f32 1.442695, %v223_v43  ;;  %v232_v46 = vmul.f32 1.442695, %v225_v44 }
  0xd6   :  { %933 = vpow2.f32 %v230_v42 }
  0xd7   :  { %935 = vpow2.f32 %v228_v45 }
  0xd8   :  { %937 = vpow2.f32 %v232_v46 }
  0xe2   :  { %v932_v47 = vpop.eup %931 }
  0xe3   :  { %v934_v48 = vpop.eup %933  ;;  %v911_v50 = vadd.f32 -1.0, %v932_v47 }
  0xe4   :  { %v936_v49 = vpop.eup %935  ;;  %v913_v54 = vadd.f32 -1.0, %v934_v48 }
  0xe5   :  { %v938_v51 = vpop.eup %937  ;;  %v912_v52 = vadd.f32 -1.0, %v936_v49  ;;  %v250_v62 = vsel %vm238_vm5, %v911_v50, %v246_v57  ;;  %v242_v2 = vsel %vm238_vm5, %v143_v29, %v911_v50  ;;  %v551_v50 = vpop.permute.xlu1 %550 }
  0xe6   :  { %v914_v55 = vadd.f32 -1.0, %v938_v51  ;;  %v252_v63 = vsel %vm240_vm6, %v913_v54, %v248_v59  ;;  %v244_v4 = vsel %vm240_vm6, %v214_v30, %v913_v54 }
  0xe7   :  { %v251_v58 = vsel %vm239_vm3, %v912_v52, %v247_v53  ;;  %v243_v0 = vsel %vm239_vm3, %v145_v35, %v912_v52 }
  0xe8   :  { %290 = vmatprep.subr.mxu0 %v251_v58  ;;  %v253_v61 = vsel %vm241_vm4, %v914_v55, %v249_v56  ;;  %v245_v1 = vsel %vm241_vm4, %v216_v36, %v914_v55 }
  0xe9   :  { %361 = vmatprep.subr.mxu1 %v253_v61  ;;  %291 = vmatpush1.msra.mxu0 %v250_v62 }
  0xea   :  { %362 = vmatpush1.msra.mxu1 %v252_v63  ;;  %915 = vmatmul.mubr.msk.f32.vlgmr.msra.gmra.mxu0 %vm256_vm2, %v255_v60 }
  0xeb   :  { %916 = vmatmul.mubr.msk.f32.vlgmr.msra.gmra.mxu1 %vm256_vm2, %v255_v60  ;;  %435 = vmatprep.subr.mxu0 %v243_v0 }
  0xec   :  { %506 = vmatprep.subr.mxu1 %v245_v1  ;;  %436 = vmatpush1.msra.mxu0 %v242_v2 }
  0xed   :  { %507 = vmatpush1.msra.mxu1 %v244_v4  ;;  %592 = vmatprep.subr.mxu0 %v251_v58 }
  0xee   :  { %663 = vmatprep.subr.mxu1 %v253_v61  ;;  %469 = vmatprep.mubr.f32.mxu0 %v955_v3 }
  0xef   :  { %540 = vmatprep.mubr.f32.mxu1 %v955_v3  ;;  %917 = vmatmul.mubr.msk.f32.vlgmr.msra.gmra.mxu0 %vm256_vm2, %v254_v5 }
  0xf0   :  { %918 = vmatmul.mubr.msk.f32.vlgmr.msra.gmra.mxu1 %vm256_vm2, %v254_v5  ;;  %593 = vmatpush1.msra.mxu0 %v250_v62 }
  0xf1   :  { %664 = vmatpush1.msra.mxu1 %v252_v63  ;;  %737 = vmatprep.subr.mxu0 %v243_v0 }
  0xf2   :  { %808 = vmatprep.subr.mxu1 %v245_v1  ;;  %626 = vmatprep.mubr.f32.mxu0 %v955_v3 }
  0xf3   :  { %697 = vmatprep.mubr.f32.mxu1 %v955_v3  ;;  %919 = vmatmul.mubr.msk.f32.vlgmr.msra.gmra.mxu0 %vm256_vm2, %v558_v6 }
  0xf4   :  { %920 = vmatmul.mubr.msk.f32.vlgmr.msra.gmra.mxu1 %vm256_vm2, %v558_v6  ;;  %738 = vmatpush1.msra.mxu0 %v242_v2 }
  0xf5   :  { %809 = vmatpush1.msra.mxu1 %v244_v4  ;;  %771 = vmatprep.mubr.f32.mxu0 %v955_v3 }
  0xf6   :  { %842 = vmatprep.mubr.f32.mxu1 %v955_v3  ;;  %v853_v3 = vpop.permute.xlu0 %852 }
  0xf7   :  { %921 = vmatmul.mubr.msk.f32.vlgmr.msra.gmra.mxu0 %vm256_vm2, %v557_v7 }
  0xf8   :  { %922 = vmatmul.mubr.msk.f32.vlgmr.msra.gmra.mxu1 %vm256_vm2, %v557_v7 }
 0x1aa   :  { %v326_v8 = vpop.f32.mrf.mxu0 }
 0x1ab   :  { %v397_v13 = vpop.f32.mrf.mxu1 }
 0x1ac   :  { %v328_v14 = vpop.f32.mrf.mxu0 }
 0x1ad   :  { %v399_v15 = vpop.f32.mrf.mxu1 }
 0x1af   :  { %v471_v16 = vpop.f32.mrf.mxu0 }
 0x1b0   :  { %v542_v17 = vpop.f32.mrf.mxu1  ;;  %v472_v48 = vadd.f32 %v471_v16, %v326_v8 }
 0x1b1   :  { %v473_v18 = vpop.f32.mrf.mxu0  ;;  %v543_v49 = vadd.f32 %v542_v17, %v397_v13 }
 0x1b2   :  { %v544_v19 = vpop.f32.mrf.mxu1  ;;  %v474_v51 = vadd.f32 %v473_v18, %v328_v14  ;;  %v553_v53 = vadd.f32 %v551_v50, %v472_v48 }
 0x1b3   :  { %v628_v20 = vpop.f32.mrf.mxu0  ;;  %v545_v52 = vadd.f32 %v544_v19, %v399_v15  ;;  %v555_v55 = vadd.f32 %v551_v50, %v543_v49 }
 0x1b4   :  { %v699_v21 = vpop.f32.mrf.mxu1  ;;  %v554_v57 = vadd.f32 %v551_v50, %v474_v51 }
 0x1b5   :  { %v630_v22 = vpop.f32.mrf.mxu0  ;;  %v556_v60 = vadd.f32 %v551_v50, %v545_v52 }
 0x1b6   :  { %v701_v23 = vpop.f32.mrf.mxu1 }
 0x1b7   :  { %v773_v24 = vpop.f32.mrf.mxu0 }
 0x1b8   :  { %v774_v25 = vadd.f32 %v773_v24, %v628_v20  ;;  %v844_v26 = vpop.f32.mrf.mxu1 }
 0x1b9   :  { %v845_v27 = vadd.f32 %v844_v26, %v699_v21  ;;  %v775_v28 = vpop.f32.mrf.mxu0 }
 0x1ba   :  { %v855_v29 = vadd.f32 %v853_v3, %v774_v25  ;;  %v776_v30 = vadd.f32 %v775_v28, %v630_v22  ;;  %v846_v31 = vpop.f32.mrf.mxu1 }
 0x1bb   :  { %v857_v32 = vadd.f32 %v853_v3, %v845_v27  ;;  %v847_v33 = vadd.f32 %v846_v31, %v701_v23 }
 0x1bc   :  { %v923_v34 = vmul.f32 -1.442695, %v855_v29  ;;  %v856_v35 = vadd.f32 %v853_v3, %v776_v30 }
 0x1bd   :  { %v925_v36 = vmul.f32 -1.442695, %v857_v32  ;;  %v858_v37 = vadd.f32 %v853_v3, %v847_v33 }
 0x1be   :  { %939 = vpow2.f32 %v923_v34  ;;  %v924_v38 = vmul.f32 -1.442695, %v856_v35 }
 0x1bf   :  { %941 = vpow2.f32 %v925_v36  ;;  %v926_v39 = vmul.f32 -1.442695, %v858_v37 }
 0x1c0   :  { %943 = vpow2.f32 %v924_v38 }
 0x1c1   :  { %945 = vpow2.f32 %v926_v39 }
 0x1cb   :  { %v940_v40 = vpop.eup %939 }
 0x1cc   :  { %v942_v41 = vpop.eup %941  ;;  %v871_v42 = vadd.f32 1.0, %v940_v40 }
 0x1cd   :  { %v944_v43 = vpop.eup %943  ;;  %v873_v44 = vadd.f32 1.0, %v942_v41 }
 0x1ce   :  { %v946_v45 = vpop.eup %945  ;;  %947 = vrcp.f32 %v871_v42  ;;  %v872_v46 = vadd.f32 1.0, %v944_v43 }
 0x1cf   :  { %949 = vrcp.f32 %v873_v44  ;;  %v874_v47 = vadd.f32 1.0, %v946_v45 }
 0x1d0   :  { %951 = vrcp.f32 %v872_v46 }
 0x1d1   :  { %953 = vrcp.f32 %v874_v47 }
 0x1db   :  { %v948_v54 = vpop.eup %947 }
 0x1dc   :  { %v950_v56 = vpop.eup %949  ;;  %v883_v58 = vmul.f32 %v948_v54, %v553_v53 }
 0x1dd   :  { %v952_v59 = vpop.eup %951  ;;  %v885_v61 = vmul.f32 %v950_v56, %v555_v55 }
 0x1de   :  { %v954_v62 = vpop.eup %953  ;;  %v884_v63 = vmul.f32 %v952_v59, %v554_v57  ;;  %v887_v1 = vadd.f32 %v883_v58, %v1046_v11 }
 0x1df   :  { %v886_v0 = vmul.f32 %v954_v62, %v556_v60  ;;  %v889_v4 = vadd.f32 %v885_v61, %v1051_v12 }
 0x1e0   :  { %v888_v2 = vadd.f32 %v884_v63, %v1036_v9 }
 0x1e1   :  { %v890_v5 = vadd.f32 %v886_v0, %v1041_v10 }
 0x1e2   :  { %v895_v6 = vcombine.low %v887_v1, %v888_v2 }
 0x1e3   :  { %v896_v7 = vcombine.low %v889_v4, %v890_v5 }
 0x1e4   :  { %899 = vst [vmem:[%s1146_s9] sm:$0xff] %v895_v6 }
 0x1e5   :  { %900 = vst [vmem:[%s1146_s9 + $0x8] sm:$0xff] %v896_v7 }

</bundles_post_ra>
